<compile_context>
chip_gen: v6e
topology: v6e:2x2x1
jax: 0.10.0
libtpu: 0.0.40
codegen_flags: <defaults>
</compile_context>

<pallas_src>
import math
import functools

import jax
import jax.numpy as jnp
import numpy as np
from jax.experimental import pallas as pl
from jax.experimental.pallas import tpu as pltpu


def attn_norm_kernel(x_ref, wqkv_ref, bqkv_ref, wo_ref, bo_ref, head_mask_ref,
                     g1_ref, b1_ref, out_ref, *, bs, sl, d_model, pack_lanes):
    """Fused self-attention (raw-score variant) + residual + LayerNorm1.

    Ref shapes (single invocation, everything VMEM resident):
      x_ref         : (bs*sl, d_model)  f32
      wqkv_ref      : (d_model, 3*d_model)  MXU dtype (bf16/f32); 1/sqrt(d_k) folded into Q cols
      bqkv_ref      : (1, 3*d_model)  f32 (scale folded into the Q third)
      wo_ref        : (d_model, d_model)  MXU dtype
      bo_ref        : (1, d_model)  f32
      head_mask_ref : (d_model, d_model)  f32, 1 on diagonal d_k x d_k head blocks, else 0
      g1_ref/b1_ref : (1, d_model)  f32 (LayerNorm1 affine)
      out_ref       : (bs*sl*d_model//128, 128) when pack_lanes else (bs*sl, d_model)
    """
    m = bs * sl
    x2 = x_ref[...].astype(jnp.float32)                 # residual / LN operand, f32
    cdt = wqkv_ref.dtype                                 # MXU operand dtype (bf16 on v6e/v7x)

    # ---- fused Q/K/V projection: one MXU pass, f32 accumulation ------------------------
    qkv = jnp.dot(x2.astype(cdt), wqkv_ref[...],
                  preferred_element_type=jnp.float32) + bqkv_ref[...]     # (m, 3*d_model)
    q = qkv[:, 0 * d_model:1 * d_model].reshape(bs, sl, d_model)          # already * 1/sqrt(d_k)
    k = qkv[:, 1 * d_model:2 * d_model].reshape(bs, sl, d_model)
    v = qkv[:, 2 * d_model:3 * d_model].reshape(bs, sl, d_model)

    # ---- all-heads reassociated attention (raw scores => linear in Q) ------------------
    # Full K^T V once, then zero the cross-head blocks: the surviving diagonal d_k x d_k
    # blocks are exactly the per-head Kh^T Vh, so Q_scaled @ ktv_masked == per-head outputs
    # laid out contiguously as (bs, sl, heads*d_k) == (bs, sl, d_model).  Single-batch-dim
    # einsums only (known-good Mosaic dot_general lowering).
    ktv = jnp.einsum('bsi,bsj->bij', k.astype(cdt), v.astype(cdt),
                     preferred_element_type=jnp.float32)                  # (bs, d_model, d_model)
    ktv = ktv * head_mask_ref[...]
    oh = jnp.einsum('bsi,bij->bsj', q.astype(cdt), ktv.astype(cdt),
                    preferred_element_type=jnp.float32)                   # (bs, sl, d_model)

    # ---- single full-width output projection (contiguous head layout, no concat) -------
    attn = jnp.dot(oh.reshape(m, d_model).astype(cdt), wo_ref[...],
                   preferred_element_type=jnp.float32) + bo_ref[...]      # (m, d_model)

    # ---- residual + LayerNorm1 (dropout1 identity at inference); f32 elementwise -------
    y = x2 + attn
    mu = jnp.mean(y, axis=-1, keepdims=True)
    var = jnp.mean((y - mu) ** 2, axis=-1, keepdims=True)
    out2 = (y - mu) * jax.lax.rsqrt(var + 1e-5) * g1_ref[...] + b1_ref[...]

    # ---- lane-dense store: pack g = 128//d_model rows per 128-lane output row ----------
    if pack_lanes:
        g = 128 // d_model
        r = m // g
        packed = jnp.concatenate([out2[c * r:(c + 1) * r, :] for c in range(g)], axis=1)
        out_ref[...] = packed.astype(out_ref.dtype)        # (r, 128) unmasked full-lane store
    else:
        out_ref[...] = out2.astype(out_ref.dtype)

    # TODO(synk): CapsNet_Text feedforward (feedforward_caps), the dropout2 residual and
    # norm2 are not implemented — the CapsNet_Text class definition is not part of the spec.


def fuse_encoder_params(params, heads, matmul_dtype=jnp.bfloat16):
    """One-time parameter preparation, hoisted out of the per-call path (review item #3).

    - Concatenates Wq|Wk|Wv into one (d_model, 3*d_model) weight (single MXU pass in-kernel).
    - Folds the 1/sqrt(d_k) score scale into the Q columns and Q bias (exact: the reference
      multiplies V by the RAW scaled scores, so attention is linear in Q).
    - Builds the block-diagonal head mask used to turn the fused K^T V into per-head Kh^T Vh.
    - Casts MXU weight operands to `matmul_dtype` (bf16 for v6e/v7x MXU peak); biases and
      LayerNorm params stay f32.
    """
    wq, bq, wk, bk, wv, bv, wo, bo, g1, b1 = params
    d_model = wq.shape[0]
    d_k = d_model // heads
    scale = 1.0 / math.sqrt(d_k)

    wqkv = jnp.concatenate([wq * scale, wk, wv], axis=1).astype(matmul_dtype)
    bqkv = jnp.concatenate([bq * scale, bk, bv], axis=1).astype(jnp.float32)
    hm = (np.arange(d_model)[:, None] // d_k) == (np.arange(d_model)[None, :] // d_k)
    head_mask = jnp.asarray(hm, jnp.float32)
    return (wqkv, bqkv, wo.astype(matmul_dtype), bo.astype(jnp.float32),
            head_mask, g1.astype(jnp.float32), b1.astype(jnp.float32))


def encoder_front(x, fused_params, mask=None):
    """norm1(x + MultiHeadAttention(x, x, x)) via one fused pallas_call.

    NOTE: faithful to the PyTorch reference's raw-score (softmax-dead-code) semantics.
    If upstream ever switches to softmax(scores) @ V, the Q(K^T V) reassociation and the
    scale-into-Wq fold become invalid and this kernel must be restructured.
    """
    if mask is not None:
        # TODO(synk): mask path — needs a (q-tile, k-tile) grid (k-axis last, "arbitrary"),
        # scores in VMEM scratch; the reassociated form is illegal once scores are masked.
        raise NotImplementedError("mask != None is not supported by this fused kernel")

    bs, sl, d_model = x.shape
    m = bs * sl
    wqkv, bqkv, wo, bo, head_mask, g1, b1 = fused_params

    # Lane-dense output slab (review item #2): pack 128//d_model rows per 128-lane row so
    # the kernel's stores are unmasked full-lane vst; the inverse below is wrapper-side
    # layout plumbing, not compute.
    pack = (d_model < 128) and (128 % d_model == 0) and (m % (128 // d_model) == 0)
    if pack:
        g = 128 // d_model
        r = m // g
        out_shape = jax.ShapeDtypeStruct((r, 128), x.dtype)
    else:
        out_shape = jax.ShapeDtypeStruct((m, d_model), x.dtype)

    kernel = functools.partial(attn_norm_kernel, bs=bs, sl=sl, d_model=d_model,
                               pack_lanes=pack)
    vmem = pl.BlockSpec(memory_space=pltpu.MemorySpace.VMEM)

    # Single invocation (no grid): at these toy shapes everything is VMEM resident and any
    # per-batch / per-M-tile grid stepping would be pure overhead (~0.35 us/step).
    # TODO(synk): production shapes — M-tile grid with dimension_semantics=("parallel",)
    # (both TCs on v7x), weights resident via constant index_maps, vmem_limit_bytes for
    # v7x's 64 MiB VMEM.
    out = pl.pallas_call(
        kernel,
        out_shape=out_shape,
        in_specs=[vmem] * 8,
        out_specs=vmem,
    )(x.reshape(m, d_model), wqkv, bqkv, wo, bo, head_mask, g1, b1)

    if pack:
        g = 128 // d_model
        r = m // g
        # out[row, c*d_model:(c+1)*d_model] holds LayerNorm row (c*r + row); invert it.
        out = out.reshape(r, g, d_model).transpose(1, 0, 2)
    return out.reshape(bs, sl, d_model)


def reference_encoder_front(x, params, heads):
    """Pure-JAX mirror of the PyTorch forward (raw-score attention, then norm1)."""
    wq, bq, wk, bk, wv, bv, wo, bo, g1, b1 = params
    bs, sl, d_model = x.shape
    d_k = d_model // heads

    Q = (x @ wq + bq).reshape(bs, sl, heads, d_k).transpose(0, 2, 1, 3)
    K = (x @ wk + bk).reshape(bs, sl, heads, d_k).transpose(0, 2, 1, 3)
    V = (x @ wv + bv).reshape(bs, sl, heads, d_k).transpose(0, 2, 1, 3)

    scores = jnp.einsum('bhqd,bhkd->bhqk', Q, K) / np.sqrt(d_k)
    out = jnp.einsum('bhqk,bhkd->bhqd', scores, V)     # RAW scores, per the reference
    concat = out.transpose(0, 2, 1, 3).reshape(bs, sl, d_model)
    sa = concat @ wo + bo

    y = x + sa                                          # dropout1 identity at eval
    mu = y.mean(-1, keepdims=True)
    var = ((y - mu) ** 2).mean(-1, keepdims=True)
    return (y - mu) / jnp.sqrt(var + 1e-5) * g1 + b1


if __name__ == "__main__":
    bs, sl, d_model, heads = 2, 8, 32, 4

    key = jax.random.PRNGKey(0)
    keys = jax.random.split(key, 16)

    def w_init(k):
        return jax.random.normal(k, (d_model, d_model), jnp.float32) * 0.05

    def b_init(k):
        return jax.random.normal(k, (1, d_model), jnp.float32) * 0.05

    wq, bq = w_init(keys[0]), b_init(keys[1])
    wk, bk = w_init(keys[2]), b_init(keys[3])
    wv, bv = w_init(keys[4]), b_init(keys[5])
    wo, bo = w_init(keys[6]), b_init(keys[7])
    g1 = 1.0 + 0.1 * jax.random.normal(keys[8], (1, d_model), jnp.float32)
    b1 = 0.1 * jax.random.normal(keys[9], (1, d_model), jnp.float32)
    params = (wq, bq, wk, bk, wv, bv, wo, bo, g1, b1)

    x = jax.random.normal(keys[10], (bs, sl, d_model), jnp.float32)

    ref = reference_encoder_front(x, params, heads)
    assert ref.shape == (bs, sl, d_model)

    # f32 MXU-operand path: verifies the restructured math (fused+masked K^T V, scale fold,
    # single Wo matmul, lane-dense packing) against the reference with tight tolerance.
    out_f32 = encoder_front(x, fuse_encoder_params(params, heads, jnp.float32))
    out_f32 = jax.block_until_ready(out_f32)
    assert out_f32.shape == (bs, sl, d_model)
    np.testing.assert_allclose(np.asarray(out_f32), np.asarray(ref), rtol=2e-4, atol=2e-5)

    # bf16 MXU-operand path (v6e/v7x feedback): operands bf16, accumulation f32,
    # residual/LayerNorm f32.  Tolerance loosened for bf16 operand rounding.
    out_bf16 = encoder_front(x, fuse_encoder_params(params, heads, jnp.bfloat16))
    out_bf16 = jax.block_until_ready(out_bf16)
    assert out_bf16.shape == (bs, sl, d_model)
    np.testing.assert_allclose(np.asarray(out_bf16), np.asarray(ref), rtol=2e-2, atol=2e-2)

    print("KERNEL_OK")
</pallas_src>

<mosaic_0001>
module attributes {stable_mosaic.version = 11 : i64} {
  func.func @attn_norm_kernel(%arg0: memref<16x32xf32, #tpu.memory_space<vmem>>, %arg1: memref<32x96xf32, #tpu.memory_space<vmem>>, %arg2: memref<1x96xf32, #tpu.memory_space<vmem>>, %arg3: memref<32x32xf32, #tpu.memory_space<vmem>>, %arg4: memref<1x32xf32, #tpu.memory_space<vmem>>, %arg5: memref<32x32xf32, #tpu.memory_space<vmem>>, %arg6: memref<1x32xf32, #tpu.memory_space<vmem>>, %arg7: memref<1x32xf32, #tpu.memory_space<vmem>>, %arg8: memref<4x128xf32, #tpu.memory_space<vmem>>) attributes {dimension_semantics = [], scalar_prefetch = 0 : i64, scratch_operands = 0 : i64, tpu.core_type = #tpu.core_type<tc>} {
    %c0 = arith.constant 0 : index
    %c0_0 = arith.constant 0 : index
    %0 = vector.load %arg0[%c0, %c0_0] : memref<16x32xf32, #tpu.memory_space<vmem>>, vector<16x32xf32>
    %c0_1 = arith.constant 0 : index
    %c0_2 = arith.constant 0 : index
    %1 = vector.load %arg1[%c0_1, %c0_2] : memref<32x96xf32, #tpu.memory_space<vmem>>, vector<32x96xf32>
    %cst = arith.constant dense<0.000000e+00> : vector<16x96xf32>
    %2 = tpu.matmul %0, %1, %cst {dimension_numbers = #tpu.dot_dimension_numbers<[1], [0], [0], [1], [0, 0, 1, 1], [], []>} : vector<16x32xf32>, vector<32x96xf32>, vector<16x96xf32> -> vector<16x96xf32>
    %c0_3 = arith.constant 0 : index
    %c0_4 = arith.constant 0 : index
    %3 = vector.load %arg2[%c0_3, %c0_4] : memref<1x96xf32, #tpu.memory_space<vmem>>, vector<1x96xf32>
    %4 = vector.broadcast %3 : vector<1x96xf32> to vector<16x96xf32>
    %5 = arith.addf %2, %4 : vector<16x96xf32>
    %6 = vector.extract_strided_slice %5 {offsets = [0, 0], sizes = [16, 32], strides = [1, 1]} : vector<16x96xf32> to vector<16x32xf32>
    %7 = vector.shape_cast %6 : vector<16x32xf32> to vector<2x8x32xf32>
    %8 = vector.extract_strided_slice %5 {offsets = [0, 32], sizes = [16, 32], strides = [1, 1]} : vector<16x96xf32> to vector<16x32xf32>
    %9 = vector.shape_cast %8 : vector<16x32xf32> to vector<2x8x32xf32>
    %10 = vector.extract_strided_slice %5 {offsets = [0, 64], sizes = [16, 32], strides = [1, 1]} : vector<16x96xf32> to vector<16x32xf32>
    %11 = vector.shape_cast %10 : vector<16x32xf32> to vector<2x8x32xf32>
    "tpu.trace_start"() <{level = 10 : i32, message = "bsi,bsj->bij"}> : () -> ()
    %cst_5 = arith.constant dense<0.000000e+00> : vector<2x32x32xf32>
    %12 = tpu.matmul %9, %11, %cst_5 {dimension_numbers = #tpu.dot_dimension_numbers<[1], [1], [2], [2], [0, 0, 0, 2, 1, 2], [0], [0]>} : vector<2x8x32xf32>, vector<2x8x32xf32>, vector<2x32x32xf32> -> vector<2x32x32xf32>
    "tpu.trace_stop"() : () -> ()
    %c0_6 = arith.constant 0 : index
    %c0_7 = arith.constant 0 : index
    %13 = vector.load %arg5[%c0_6, %c0_7] : memref<32x32xf32, #tpu.memory_space<vmem>>, vector<32x32xf32>
    %14 = vector.shape_cast %13 : vector<32x32xf32> to vector<1x32x32xf32>
    %15 = vector.broadcast %14 : vector<1x32x32xf32> to vector<2x32x32xf32>
    %16 = arith.mulf %12, %15 : vector<2x32x32xf32>
    "tpu.trace_start"() <{level = 10 : i32, message = "bsi,bij->bsj"}> : () -> ()
    %cst_8 = arith.constant dense<0.000000e+00> : vector<2x8x32xf32>
    %17 = tpu.matmul %7, %16, %cst_8 {dimension_numbers = #tpu.dot_dimension_numbers<[2], [1], [1], [2], [0, 0, 0, 1, 1, 2], [0], [0]>} : vector<2x8x32xf32>, vector<2x32x32xf32>, vector<2x8x32xf32> -> vector<2x8x32xf32>
    "tpu.trace_stop"() : () -> ()
    %18 = vector.shape_cast %17 : vector<2x8x32xf32> to vector<16x32xf32>
    %c0_9 = arith.constant 0 : index
    %c0_10 = arith.constant 0 : index
    %19 = vector.load %arg3[%c0_9, %c0_10] : memref<32x32xf32, #tpu.memory_space<vmem>>, vector<32x32xf32>
    %cst_11 = arith.constant dense<0.000000e+00> : vector<16x32xf32>
    %20 = tpu.matmul %18, %19, %cst_11 {dimension_numbers = #tpu.dot_dimension_numbers<[1], [0], [0], [1], [0, 0, 1, 1], [], []>} : vector<16x32xf32>, vector<32x32xf32>, vector<16x32xf32> -> vector<16x32xf32>
    %c0_12 = arith.constant 0 : index
    %c0_13 = arith.constant 0 : index
    %21 = vector.load %arg4[%c0_12, %c0_13] : memref<1x32xf32, #tpu.memory_space<vmem>>, vector<1x32xf32>
    %22 = vector.broadcast %21 : vector<1x32xf32> to vector<16x32xf32>
    %23 = arith.addf %20, %22 : vector<16x32xf32>
    %24 = arith.addf %0, %23 : vector<16x32xf32>
    %cst_14 = arith.constant dense<0.000000e+00> : vector<16xf32>
    %25 = vector.multi_reduction <add>, %24, %cst_14 [1] : vector<16x32xf32> to vector<16xf32>
    %26 = vector.shape_cast %25 : vector<16xf32> to vector<16x1xf32>
    %cst_15 = arith.constant 3.200000e+01 : f32
    %27 = vector.broadcast %cst_15 : f32 to vector<16x1xf32>
    %28 = arith.divf %26, %27 : vector<16x1xf32>
    %29 = vector.broadcast %28 : vector<16x1xf32> to vector<16x32xf32>
    %30 = arith.subf %24, %29 : vector<16x32xf32>
    %31 = arith.mulf %30, %30 : vector<16x32xf32>
    %cst_16 = arith.constant dense<0.000000e+00> : vector<16xf32>
    %32 = vector.multi_reduction <add>, %31, %cst_16 [1] : vector<16x32xf32> to vector<16xf32>
    %33 = vector.shape_cast %32 : vector<16xf32> to vector<16x1xf32>
    %cst_17 = arith.constant 3.200000e+01 : f32
    %34 = vector.broadcast %cst_17 : f32 to vector<16x1xf32>
    %35 = arith.divf %33, %34 : vector<16x1xf32>
    %36 = vector.broadcast %28 : vector<16x1xf32> to vector<16x32xf32>
    %37 = arith.subf %24, %36 : vector<16x32xf32>
    %cst_18 = arith.constant 9.99999974E-6 : f32
    %38 = vector.broadcast %cst_18 : f32 to vector<16x1xf32>
    %39 = arith.addf %35, %38 : vector<16x1xf32>
    %40 = math.rsqrt %39 : vector<16x1xf32>
    %41 = vector.broadcast %40 : vector<16x1xf32> to vector<16x32xf32>
    %42 = arith.mulf %37, %41 : vector<16x32xf32>
    %c0_19 = arith.constant 0 : index
    %c0_20 = arith.constant 0 : index
    %43 = vector.load %arg6[%c0_19, %c0_20] : memref<1x32xf32, #tpu.memory_space<vmem>>, vector<1x32xf32>
    %44 = vector.broadcast %43 : vector<1x32xf32> to vector<16x32xf32>
    %45 = arith.mulf %42, %44 : vector<16x32xf32>
    %c0_21 = arith.constant 0 : index
    %c0_22 = arith.constant 0 : index
    %46 = vector.load %arg7[%c0_21, %c0_22] : memref<1x32xf32, #tpu.memory_space<vmem>>, vector<1x32xf32>
    %47 = vector.broadcast %46 : vector<1x32xf32> to vector<16x32xf32>
    %48 = arith.addf %45, %47 : vector<16x32xf32>
    %49 = vector.extract_strided_slice %48 {offsets = [0, 0], sizes = [4, 32], strides = [1, 1]} : vector<16x32xf32> to vector<4x32xf32>
    %50 = vector.extract_strided_slice %48 {offsets = [4, 0], sizes = [4, 32], strides = [1, 1]} : vector<16x32xf32> to vector<4x32xf32>
    %51 = vector.extract_strided_slice %48 {offsets = [8, 0], sizes = [4, 32], strides = [1, 1]} : vector<16x32xf32> to vector<4x32xf32>
    %52 = vector.extract_strided_slice %48 {offsets = [12, 0], sizes = [4, 32], strides = [1, 1]} : vector<16x32xf32> to vector<4x32xf32>
    %53 = tpu.concatenate %49, %50, %51, %52 in 1 : vector<4x32xf32>, vector<4x32xf32>, vector<4x32xf32>, vector<4x32xf32> -> vector<4x128xf32>
    %c0_23 = arith.constant 0 : index
    %c0_24 = arith.constant 0 : index
    %54 = vector.load %arg8[%c0_23, %c0_24] : memref<4x128xf32, #tpu.memory_space<vmem>>, vector<4x128xf32>
    tpu.vector_store %arg8[%c0_23, %c0_24], %53 {strides = array<i32>} : memref<4x128xf32, #tpu.memory_space<vmem>>, vector<4x128xf32>,
    return
  }
}

</mosaic_0001>

<bundles_post_ra>
// kernel: tpu_custom_call.1
= control target key start
LH: loop header
LB: loop body
LE: loop exit
PB: predicated region body
PF: predicated region fallthrough
CT: control target
= control target key end

     0   :  { %13 = vsyncpa [#allocation3], 0  ;;  %s1157_s0 = inlined_call_operand.hbm [shape: f32[16,32], index: 0, kind: input, shape index: {}]   ;;  %s1158_s1 = inlined_call_operand.hbm [shape: f32[32,96], index: 1, kind: input, shape index: {}]   ;;  %s1159_s2 = inlined_call_operand.vmem [shape: f32[1,96], index: 2, kind: input, shape index: {}]   ;;  %s1160_s3 = inlined_call_operand.hbm [shape: f32[32,32], index: 3, kind: input, shape index: {}]   ;;  %s1161_s4 = inlined_call_operand.vmem [shape: f32[1,32], index: 4, kind: input, shape index: {}]   ;;  %s1162_s5 = inlined_call_operand.hbm [shape: f32[32,32], index: 5, kind: input, shape index: {}]   ;;  %s1163_s6 = inlined_call_operand.vmem [shape: f32[1,32], index: 6, kind: input, shape index: {}]   ;;  %s1164_s7 = inlined_call_operand.vmem [shape: f32[1,32], index: 7, kind: input, shape index: {}]   ;;  %s1165_s8 = inlined_call_operand.hbm [shape: f32[4,128], index: 8, kind: output, shape index: {}]  }
   0x1   :  { %14 = vsyncpa [#allocation6], 0 }
   0x2   :  { %15 = vsyncpa [#allocation9], 0 }
   0x3   :  { %16 = vsyncpa [#allocation4], 0  ;;  %s1018_s27 = smov [#allocation5]   ;;  %s1019_s29 = smov [#allocation2]  }
   0x4   :  { %s34_s28 = sshll.u32 %s1018_s27, 4  ;;  %s22_s30 = sshll.u32 %s1019_s29, 4  ;;  %s35_s28 = int_to_ptr.vmem [resolvable:$true] %s34_s28  ;;  %s23_s30 = int_to_ptr.vmem [resolvable:$true] %s22_s30 }
   0x5   :  { %s918_s9 = scalar_lea.vmem %s35_s28, 512  ;;  %p923_p1 = scmp.lt.s32.totalorder %s35_s28, %s35_s28 }
   0x6   :  { %p919_p0 = scmp.ne.s32.totalorder %s35_s28, %s918_s9  ;;  %p924_p2 = scmp.lt.s32.totalorder %s918_s9, %s918_s9 }
   0x8   :  { %p925_p3 = por %p924_p2, %p923_p1 }
   0xa   :  { %p926_p4 = pnand %p925_p3, %p919_p0 }
   0xc   :  { %929 = shalt.err (!%p926_p4)
}
   0xd   :  { %s1020_s10 = smov 128   ;;  %s1021_s11 = smov 8  }
   0xe   :  { %40 = dma.hbm_to_vmem [thread:$0]  %s1158_s1, 512, %s35_s28, [#allocation6], %s1020_s10, %s1020_s10, %s1021_s11  }
   0xf   :  { %s938_s14 = scalar_lea.vmem %s23_s30, 256  ;;  %p943_p6 = scmp.lt.s32.totalorder %s23_s30, %s23_s30 }
  0x10   :  { %p939_p5 = scmp.ne.s32.totalorder %s23_s30, %s938_s14  ;;  %p944_p7 = scmp.lt.s32.totalorder %s938_s14, %s938_s14 }
  0x12   :  { %p945_p8 = por %p944_p7, %p943_p6 }
  0x14   :  { %p946_p9 = pnand %p945_p8, %p939_p5 }
  0x16   :  { %949 = shalt.err (!%p946_p9)
}
  0x17   :  { %28 = dma.hbm_to_vmem [thread:$0]  %s1157_s0, 256, %s23_s30, [#allocation3], %s1020_s10, %s1020_s10, %s1021_s11  }
  0x18   :  { %s1022_s17 = smov [#allocation7]   ;;  %s1023_s19 = smov [#allocation8]  }
  0x19   :  { %s48_s18 = sshll.u32 %s1022_s17, 4  ;;  %s62_s20 = sshll.u32 %s1023_s19, 4  ;;  %s49_s18 = int_to_ptr.vmem [resolvable:$true] %s48_s18  ;;  %s63_s20 = int_to_ptr.vmem [resolvable:$true] %s62_s20 }
  0x1a   :  { %s958_s1 = scalar_lea.vmem %s49_s18, 512  ;;  %p963_p11 = scmp.lt.s32.totalorder %s49_s18, %s49_s18 }
  0x1b   :  { %p959_p10 = scmp.ne.s32.totalorder %s49_s18, %s958_s1  ;;  %p964_p12 = scmp.lt.s32.totalorder %s958_s1, %s958_s1 }
  0x1d   :  { %p965_p13 = por %p964_p12, %p963_p11 }
  0x1f   :  { %p966_p0 = pnand %p965_p13, %p959_p10 }
  0x21   :  { %969 = shalt.err (!%p966_p0)
}
  0x22   :  { %54 = dma.hbm_to_vmem [thread:$0]  %s1160_s3, 512, %s49_s18, [#allocation6], %s1020_s10, %s1020_s10, %s1021_s11  }
  0x23   :  { %s978_s0 = scalar_lea.vmem %s63_s20, 512  ;;  %p983_p2 = scmp.lt.s32.totalorder %s63_s20, %s63_s20 }
  0x24   :  { %p979_p1 = scmp.ne.s32.totalorder %s63_s20, %s978_s0  ;;  %p984_p3 = scmp.lt.s32.totalorder %s978_s0, %s978_s0 }
  0x26   :  { %p985_p4 = por %p984_p3, %p983_p2 }
  0x28   :  { %p986_p5 = pnand %p985_p4, %p979_p1 }
  0x2a   :  { %989 = shalt.err (!%p986_p5)
}
  0x2b   :  { %68 = dma.hbm_to_vmem [thread:$0]  %s1162_s5, 512, %s63_s20, [#allocation9], %s1020_s10, %s1020_s10, %s1021_s11  }
  0x2c   :  { %1010 = dma.done.wait [#allocation3], 256  }
  0x2d   :  { %1011 = vsyncadd [#allocation3], 4294967040 }
  0x2e   :  { %1012 = dma.done.wait [#allocation6], 1024  }
  0x2f   :  { %1013 = vsyncadd [#allocation6], 4294966272 }
  0x30   :  { %1014 = dma.done.wait [#allocation9], 512  }
  0x31   :  { %1015 = vsyncadd [#allocation9], 4294966784  ;;  %vm98_vm0 = vcmask 261120   ;;  %v90_v0 = vld [vmem:[#allocation5 + $0x18] sm:$0xff]  ;;  %v89_v1 = vld [vmem:[#allocation5 + $0x10] sm:$0xff]  ;;  %s1024_s25 = smov 64  }
  0x32   :  { %834 = vmatprep.subr.mxu0 %v90_v0  ;;  %v1099_v2 = vld [vmem:[#allocation2] sm:$0xff]  ;;  %v88_v3 = vld [vmem:[#allocation5 + $0x8] sm:$0xff]  ;;  %v87_v4 = vld [vmem:[#allocation5] sm:$0xff]  ;;  %s1025_s26 = smov 96   ;;  %vm219_vm1 = vcmask 64512   ;;  %v1026_v23 = vmov 0.0  }
  0x33   :  { %835 = vmatpush3.msra.mxu0 %v90_v0  ;;  %842 = vmatprep.mubr.msk.f32.mxu0 %vm98_vm0, %v1099_v2  ;;  %v1103_v5 = vld [vmem:[#allocation2 + $0x8] sm:$0xff]  ;;  %v784_v6 = vld [vmem:[%s1159_s2] ss:$0 sm:$0xff]  ;;  %vm1027_vm2 = vmmov 0   ;;  %v454_v30 = vld [vmem:[#allocation8 + $0x8] sm:$0xff]  ;;  %s1028_s9 = smov 32  }
  0x34   :  { %836 = vmatprep.subr.mxu0 %v89_v1  ;;  %v456_v26 = vld [vmem:[#allocation8 + $0x18] sm:$0xff]  ;;  %v455_v28 = vld [vmem:[#allocation8 + $0x10] sm:$0xff]  ;;  %v453_v33 = vld [vmem:[#allocation8] sm:$0xff]  ;;  %vm762_vm3 = vcmask 523264   ;;  %vm764_vm4 = vcmask 785408  }
  0x35   :  { %837 = vmatpush3.msra.mxu0 %v89_v1  ;;  %v612_v44 = vld [vmem:[#allocation7 + $0x18] sm:$0xff]  ;;  %v611_v45 = vld [vmem:[#allocation7 + $0x10] sm:$0xff]  ;;  %v610_v46 = vld [vmem:[#allocation7 + $0x8] sm:$0xff] }
  0x36   :  { %838 = vmatprep.subr.mxu0 %v88_v3  ;;  %v609_v47 = vld [vmem:[#allocation7] sm:$0xff]  ;;  %v797_v52 = vld [vmem:[%s1161_s4] ss:$0 sm:$0xff] }
  0x37   :  { %839 = vmatpush3.msra.mxu0 %v88_v3 }
  0x38   :  { %840 = vmatprep.subr.mxu0 %v87_v4 }
  0x39   :  { %841 = vmatpush3.msra.mxu0 %v87_v4 }
  0x3a   :  { %843 = vmatmul.mubr.msk.f32.vlgmr.msra.gmra.mxu0 %vm98_vm0, %v1103_v5  ;;  %861 = vmatprep.subr.mxu0 %v1026_v23 }
  0x3b   :  { %869 = vmatprep.mubr.msk.f32.mxu0 %vm1027_vm2, %v1026_v23 }
  0xfa   :  { %v844_v7 = vpop.f32.mrf.mxu0 }
  0xfb   :  { %v1110_v8 = vadd.f32 %v844_v7, %v784_v6 }
  0xfc   :  { %v171_v9 = vpop.f32.mrf.mxu0 }
  0xfd   :  { %v1112_v10 = vadd.f32 %v784_v6, %v171_v9  ;;  %353 = vrot.lane.b32.xlu1 %v1110_v8, %s1024_s25 }
  0xff   :  { %181 = vrot.lane.b32.xlu0 %v1112_v10, %s1025_s26 }
 0x101   :  { %216 = vrot.lane.b32.xlu1 %v1112_v10, %s1024_s25 }
 0x103   :  { %318 = vrot.lane.b32.xlu0 %v1110_v8, %s1025_s26 }
 0x16f   :  { %v354_v11 = vpop.permute.xlu1 %353 }
 0x171   :  { %v182_v12 = vpop.permute.xlu0 %181 }
 0x172   :  { %184 = vxpose.xlu0.b32.start.end [1/1] (short) (narrow) %v182_v12, 32 }
 0x173   :  { %v217_v13 = vpop.permute.xlu1 %216 }
 0x174   :  { %845 = vmatprep.subr.mxu1 %v217_v13 }
 0x175   :  { %846 = vmatpush3.msra.mxu1 %v217_v13  ;;  %v319_v14 = vpop.permute.xlu0 %318 }
 0x176   :  { %853 = vmatprep.subr.mxu1 %v354_v11  ;;  %321 = vxpose.xlu1.b32.start.end [1/1] (short) (narrow) %v319_v14, 32  ;;  %v800_v14 = vld [vmem:[%s1163_s6] ss:$0 sm:$0xff]  ;;  %s1029_s6 = smov [#allocation10]  }
 0x1ee   :  { %v200_v15 = vpop.trf.xlu0 }
 0x1ef   :  { %847 = vmatprep.mubr.msk.f32.mxu1 %vm219_vm1, %v200_v15 }
 0x1f2   :  { %v201_v16 = vpop.trf.xlu0  ;;  %v337_v17 = vpop.trf.xlu1 }
 0x1f3   :  { %848 = vmatmul.mubr.msk.f32.vlgmr.msra.gmra.mxu1 %vm219_vm1, %v201_v16  ;;  %v801_v16 = vld [vmem:[%s1164_s7] ss:$0 sm:$0xff]  ;;  %s773_s7 = sshll.u32 %s1029_s6, 4  ;;  %s774_s7 = int_to_ptr.vmem [resolvable:$true] %s773_s7 }
 0x1f4   :  { %854 = vmatpush3.msra.mxu1 %v354_v11  ;;  %s990_s10 = scalar_lea.vmem %s774_s7, 64  ;;  %p995_p7 = scmp.lt.s32.totalorder %s774_s7, %s774_s7 }
 0x1f5   :  { %872 = vmatprep.subr.mxu1 %v1026_v23  ;;  %p991_p6 = scmp.ne.s32.totalorder %s774_s7, %s990_s10  ;;  %p996_p8 = scmp.lt.s32.totalorder %s990_s10, %s990_s10 }
 0x1f6   :  { %v202_v18 = vpop.trf.xlu0  ;;  %v338_v19 = vpop.trf.xlu1 }
 0x1f7   :  { %850 = vmatprep.mubr.msk.f32.mxu1 %vm219_vm1, %v202_v18  ;;  %p997_p9 = por %p996_p8, %p995_p7 }
 0x1f9   :  { %p998_p10 = pnand %p997_p9, %p991_p6 }
 0x1fa   :  { %v203_v20 = vpop.trf.xlu0  ;;  %v339_v21 = vpop.trf.xlu1 }
 0x1fb   :  { %851 = vmatmul.mubr.msk.f32.gmra.mxu1 %vm219_vm1, %v203_v20 }
 0x1fc   :  { %855 = vmatprep.mubr.msk.f32.mxu1 %vm219_vm1, %v337_v17 }
 0x1fe   :  { %v340_v22 = vpop.trf.xlu1 }
 0x1ff   :  { %856 = vmatmul.mubr.msk.f32.vlgmr.msra.gmra.mxu1 %vm219_vm1, %v338_v19 }
 0x200   :  { %858 = vmatprep.mubr.msk.f32.mxu1 %vm219_vm1, %v339_v21 }
 0x203   :  { %859 = vmatmul.mubr.msk.f32.gmra.mxu1 %vm219_vm1, %v340_v22 }
 0x204   :  { %880 = vmatprep.mubr.msk.f32.mxu1 %vm1027_vm2, %v1026_v23 }
 0x2b3   :  { %v849_v24 = vpop.f32.mrf.mxu1 }
 0x2b4   :  { %v458_v35 = vmul.f32 %v849_v24, %v454_v30 }
 0x2b5   :  { %v298_v25 = vpop.f32.mrf.mxu1 }
 0x2b6   :  { %v457_v37 = vmul.f32 %v453_v33, %v298_v25 }
 0x2bb   :  { %v852_v27 = vpop.f32.mrf.mxu1 }
 0x2bc   :  { %v460_v29 = vmul.f32 %v852_v27, %v456_v26 }
 0x2bd   :  { %v308_v31 = vpop.f32.mrf.mxu1 }
 0x2be   :  { %v459_v32 = vmul.f32 %v455_v28, %v308_v31  ;;  %862 = vmatpush3.msra.mxu0 %v460_v29 }
 0x2bf   :  { %v857_v34 = vpop.f32.mrf.mxu1  ;;  %863 = vmatprep.subr.mxu0 %v1026_v23 }
 0x2c0   :  { %864 = vmatpush3.msra.mxu0 %v459_v32  ;;  %v462_v42 = vmul.f32 %v857_v34, %v454_v30 }
 0x2c1   :  { %v434_v36 = vpop.f32.mrf.mxu1  ;;  %865 = vmatprep.subr.mxu0 %v1026_v23 }
 0x2c2   :  { %866 = vmatpush3.msra.mxu0 %v458_v35  ;;  %v461_v43 = vmul.f32 %v453_v33, %v434_v36 }
 0x2c3   :  { %v860_v38 = vpop.f32.mrf.mxu1  ;;  %867 = vmatprep.subr.mxu0 %v1026_v23 }
 0x2c4   :  { %v464_v39 = vmul.f32 %v860_v38, %v456_v26  ;;  %868 = vmatpush3.msra.mxu0 %v457_v37 }
 0x2c5   :  { %v444_v40 = vpop.f32.mrf.mxu1  ;;  %870 = vmatmul.mubr.msk.f32.vlgmr.msra.gmra.mxu0 %vm98_vm0, %v1112_v10  ;;  %883 = vmatprep.subr.mxu0 %v612_v44 }
 0x2c6   :  { %v463_v41 = vmul.f32 %v455_v28, %v444_v40  ;;  %873 = vmatpush3.msra.mxu1 %v464_v39  ;;  %884 = vmatpush3.msra.mxu0 %v612_v44 }
 0x2c7   :  { %874 = vmatprep.subr.mxu1 %v1026_v23  ;;  %885 = vmatprep.subr.mxu0 %v611_v45 }
 0x2c8   :  { %875 = vmatpush3.msra.mxu1 %v463_v41  ;;  %886 = vmatpush3.msra.mxu0 %v611_v45 }
 0x2c9   :  { %876 = vmatprep.subr.mxu1 %v1026_v23  ;;  %887 = vmatprep.subr.mxu0 %v610_v46 }
 0x2ca   :  { %877 = vmatpush3.msra.mxu1 %v462_v42  ;;  %888 = vmatpush3.msra.mxu0 %v610_v46 }
 0x2cb   :  { %878 = vmatprep.subr.mxu1 %v1026_v23  ;;  %889 = vmatprep.subr.mxu0 %v609_v47 }
 0x2cc   :  { %879 = vmatpush3.msra.mxu1 %v461_v43  ;;  %890 = vmatpush3.msra.mxu0 %v609_v47 }
 0x2cd   :  { %881 = vmatmul.mubr.msk.f32.vlgmr.msra.gmra.mxu1 %vm98_vm0, %v1110_v8 }
 0x385   :  { %v533_v48 = vpop.f32.mrf.mxu0 }
 0x386   :  { %891 = vmatprep.mubr.msk.f32.mxu0 %vm98_vm0, %v533_v48 }
 0x387   :  { %v871_v49 = vpop.f32.mrf.mxu0 }
 0x38d   :  { %v605_v50 = vpop.f32.mrf.mxu1 }
 0x38e   :  { %892 = vmatmul.mubr.msk.f32.vlgmr.msra.gmra.mxu0 %vm98_vm0, %v605_v50 }
 0x38f   :  { %v882_v51 = vpop.f32.mrf.mxu1 }
 0x44e   :  { %v893_v53 = vpop.f32.mrf.mxu0 }
 0x44f   :  { %v698_v54 = vadd.f32 %v893_v53, %v797_v52 }
 0x450   :  { %v692_v55 = vpop.f32.mrf.mxu0 }
 0x451   :  { %v693_v56 = vadd.f32 %v797_v52, %v692_v55  ;;  %v702_v57 = vadd.f32 %v698_v54, %v1103_v5 }
 0x453   :  { %v706_v58 = vsel %vm98_vm0, %v702_v57, 0.0  ;;  %v701_v59 = vadd.f32 %v693_v56, %v1099_v2 }
 0x454   :  { %707 = vadd.xlane.f32.xlu1 %v706_v58 }
 0x455   :  { %v703_v60 = vsel %vm98_vm0, %v701_v59, 0.0 }
 0x456   :  { %704 = vadd.xlane.f32.xlu0 %v703_v60 }
 0x4dd   :  { %v708_v61 = vpop.xlane.xlu1 %707 }
 0x4de   :  { %v711_v62 = vmul.f32 0.03125, %v708_v61 }
 0x4df   :  { %v705_v63 = vpop.xlane.xlu0 %704 }
 0x4e0   :  { %v710_v0 = vmul.f32 0.03125, %v705_v63  ;;  %v713_v1 = vsub.f32 %v702_v57, %v711_v62 }
 0x4e2   :  { %v712_v3 = vsub.f32 %v701_v59, %v710_v0  ;;  %v715_v7 = vmul.f32 %v713_v1, %v713_v1 }
 0x4e4   :  { %v714_v4 = vmul.f32 %v712_v3, %v712_v3  ;;  %v719_v5 = vsel %vm98_vm0, %v715_v7, 0.0 }
 0x4e6   :  { %v716_v6 = vsel %vm98_vm0, %v714_v4, 0.0 }
 0x4e7   :  { %717 = vadd.xlane.f32.xlu0 %v716_v6 }
 0x4eb   :  { %720 = vadd.xlane.f32.xlu0 %v719_v5 }
 0x570   :  { %v718_v8 = vpop.xlane.xlu0 %717 }
 0x571   :  { %v722_v2 = vmul.f32 0.03125, %v718_v8 }
 0x573   :  { %v724_v9 = vadd.f32 1e-05, %v722_v2 }
 0x574   :  { %v721_v10 = vpop.xlane.xlu0 %720 }
 0x575   :  { %906 = vrsqrt.f32 %v724_v9  ;;  %v723_v11 = vmul.f32 0.03125, %v721_v10 }
 0x577   :  { %v725_v12 = vadd.f32 1e-05, %v723_v11 }
 0x579   :  { %908 = vrsqrt.f32 %v725_v12 }
 0x582   :  { %v907_v13 = vpop.eup %906 }
 0x583   :  { %v728_v15 = vmul.f32 %v907_v13, %v712_v3 }
 0x585   :  { %v737_v17 = vmul.f32 %v800_v14, %v728_v15 }
 0x586   :  { %v909_v18 = vpop.eup %908 }
 0x587   :  { %v746_v19 = vadd.f32 %v801_v16, %v737_v17  ;;  %v729_v20 = vmul.f32 %v909_v18, %v713_v1 }
 0x589   :  { %v749_v21 = vrot.slane %v746_v19, 4  ;;  %v738_v22 = vmul.f32 %v800_v14, %v729_v20 }
 0x58b   :  { %750 = vrot.lane.b32.xlu1 %v749_v21, %s1028_s9  ;;  %v747_v23 = vadd.f32 %v801_v16, %v738_v22 }
 0x58d   :  { %754 = vrot.lane.b32.xlu0 %v747_v23, %s1024_s25  ;;  %v757_v24 = vrot.slane %v747_v23, 4 }
 0x58f   :  { %758 = vrot.lane.b32.xlu1 %v757_v24, %s1025_s26 }
 0x5fd   :  { %v751_v25 = vpop.permute.xlu1 %750 }
 0x5fe   :  { %v761_v26 = vsel %vm98_vm0, %v746_v19, %v751_v25 }
 0x5ff   :  { %v755_v27 = vpop.permute.xlu0 %754 }
 0x600   :  { %v763_v28 = vsel %vm762_vm3, %v761_v26, %v755_v27 }
 0x601   :  { %v759_v29 = vpop.permute.xlu1 %758 }
 0x602   :  { %v765_v30 = vsel %vm764_vm4, %v763_v28, %v759_v29 }
 0x603   :  { %766 = vst [vmem:[#allocation10] sm:$0xf] %v765_v30 }
 0x604   :  { %1001 = shalt.err (!%p998_p10)
}
 0x605   :  { %776 = dma.vmem_to_hbm [thread:$0]  %s774_s7, 64, %s1165_s8, [#allocation4]  }
 0x606   :  { %1016 = dma.done.wait [#allocation4], 64  }
 0x607   :  { %1017 = vsyncadd [#allocation4], 4294967232 }
 0x608   :  { %780 = vsyncpa [#allocation3], 1 }
 0x609   :  { %781 = vsyncpa [#allocation6], 1 }
 0x60a   :  { %782 = vsyncpa [#allocation9], 1 }
 0x60b   :  { %783 = vsyncpa [#allocation4], 1 }

</bundles_post_ra>
